<compile_context>
chip_gen: v7x
topology: tpu7x:2x2x1
jax: 0.10.0
libtpu: 0.0.40
codegen_flags: <defaults>
</compile_context>

<pallas_src>
import functools
import math

import jax
import jax.numpy as jnp
from jax import lax
from jax.experimental import pallas as pl
from jax.experimental.pallas import tpu as pltpu


def _mha_kernel(x_ref, wqkv_ref, wo_ref, bo_ref, out_ref, *,
                batch, seq, num_heads, head_dim, d_out):
    B, T, H, hd = batch, seq, num_heads, head_dim

    x = x_ref[...]                                    # (B*T, d_in), native dtype
    wqkv = wqkv_ref[...]                              # (d_in, 3*d_out)

    # Single fused QKV projection, f32 accumulation on the MXU.
    qkv = jnp.dot(x, wqkv, preferred_element_type=jnp.float32)   # (B*T, 3*d_out)

    # Fold the softmax scale into q once (cheaper than scaling the score matrix,
    # and independent of the -inf mask).
    scale = 1.0 / math.sqrt(hd)
    q2 = qkv[:, 0 * d_out:1 * d_out] * scale
    k2 = qkv[:, 1 * d_out:2 * d_out]
    v2 = qkv[:, 2 * d_out:3 * d_out]

    def to_heads(a2):
        # (B*T, H*hd) -> (B*H, T, hd) via static, tile-aligned slices + one
        # sublane concat (avoids a 4-D transpose inside the kernel).
        blocks = [a2[b * T:(b + 1) * T, h * hd:(h + 1) * hd]
                  for b in range(B) for h in range(H)]
        return jnp.concatenate(blocks, axis=0).reshape(B * H, T, hd)

    qh = to_heads(q2)
    kh = to_heads(k2)
    vh = to_heads(v2)

    # All (batch, head) score matrices in one batched contraction over hd
    # (no explicit kh.T; the MXU consumes the contracted operand natively).
    s = jnp.einsum('bqd,bkd->bqk', qh, kh,
                   preferred_element_type=jnp.float32)           # (B*H, T, T)

    # One shared causal mask broadcast across all B*H slices.
    row = lax.broadcasted_iota(jnp.int32, (T, T), 0)
    col = lax.broadcasted_iota(jnp.int32, (T, T), 1)
    s = jnp.where((col > row)[None, :, :], -jnp.inf, s)

    # Softmax in f32.
    m = jnp.max(s, axis=-1, keepdims=True)
    e = jnp.exp(s - m)
    w = e / jnp.sum(e, axis=-1, keepdims=True)
    # TODO(synk): dropout is identity here (p=0.0 / eval mode); no stateful
    # dropout applied inside the kernel.

    ctx = jnp.einsum('bqk,bkd->bqd', w, vh,
                     preferred_element_type=jnp.float32)         # (B*H, T, hd)

    # Inverse head re-layout: (B*H, T, hd) -> (B*T, H*hd).
    ctx2 = ctx.reshape(B * H * T, hd)
    rows = []
    for b in range(B):
        head_cols = [ctx2[(b * H + h) * T:(b * H + h + 1) * T, :]
                     for h in range(H)]
        rows.append(jnp.concatenate(head_cols, axis=1))          # (T, d_out)
    ctx_flat = jnp.concatenate(rows, axis=0)                     # (B*T, d_out)

    # Output projection + bias; single full-tile store.
    out = jnp.dot(ctx_flat, wo_ref[...], preferred_element_type=jnp.float32)
    out = out + bo_ref[...].astype(jnp.float32)
    out_ref[...] = out.astype(out_ref.dtype)


def multi_head_attention(x, wq, wk, wv, wo, bo, num_heads):
    """Forward pass of MultiHeadAttention (use_cache=False). Returns (out, None).

    TODO(synk): the use_cache=True / KV-cache branch of the PyTorch module is
    not implemented in this kernel.
    """
    B, T, d_in = x.shape
    d_out = wq.shape[1]
    assert d_out % num_heads == 0
    head_dim = d_out // num_heads

    # Fuse the three projection weights once in the wrapper (one weight DMA,
    # one wide matmul in the kernel).
    wqkv = jnp.concatenate([wq, wk, wv], axis=1)                 # (d_in, 3*d_out)
    # Fold batch into the row dim: the whole problem runs in one grid step
    # (no per-batch grid-step overhead on single-TC chips).
    x2 = x.reshape(B * T, d_in)

    kernel = functools.partial(
        _mha_kernel, batch=B, seq=T, num_heads=num_heads,
        head_dim=head_dim, d_out=d_out)

    out2 = pl.pallas_call(
        kernel,
        out_shape=jax.ShapeDtypeStruct((B * T, d_out), x.dtype),
        in_specs=[
            pl.BlockSpec((B * T, d_in), lambda: (0, 0)),          # x (folded)
            pl.BlockSpec((d_in, 3 * d_out), lambda: (0, 0)),      # fused Wqkv
            pl.BlockSpec((d_out, d_out), lambda: (0, 0)),         # Wo
            pl.BlockSpec((1, d_out), lambda: (0, 0)),             # bo
        ],
        out_specs=pl.BlockSpec((B * T, d_out), lambda: (0, 0)),
        compiler_params=pltpu.CompilerParams(vmem_limit_bytes=32 * 1024 * 1024),
    )(x2, wqkv, wo, bo)
    return out2.reshape(B, T, d_out), None


def _reference(x, wq, wk, wv, wo, bo, num_heads):
    B, T, d_in = x.shape
    d_out = wq.shape[1]
    hd = d_out // num_heads
    q = x @ wq
    k = x @ wk
    v = x @ wv
    q = q.reshape(B, T, num_heads, hd).transpose(0, 2, 1, 3)
    k = k.reshape(B, T, num_heads, hd).transpose(0, 2, 1, 3)
    v = v.reshape(B, T, num_heads, hd).transpose(0, 2, 1, 3)
    s = jnp.einsum("bhqd,bhkd->bhqk", q, k)
    mask = jnp.triu(jnp.ones((T, T), dtype=bool), k=1)[None, None]
    s = jnp.where(mask, -jnp.inf, s) / math.sqrt(hd)
    w = jax.nn.softmax(s, axis=-1)
    ctx = jnp.einsum("bhqk,bhkd->bhqd", w, v).transpose(0, 2, 1, 3).reshape(B, T, d_out)
    return ctx @ wo + bo


if __name__ == "__main__":
    # Module config: d_in=32, d_out=64, context_length>=8, dropout=0.0,
    # num_heads=2, qkv_bias=False
    B, T, d_in, d_out, num_heads = 2, 8, 32, 64, 2

    key = jax.random.PRNGKey(0)
    kx, kq, kk, kv, ko, kb = jax.random.split(key, 6)

    x = jax.random.normal(kx, (B, T, d_in), dtype=jnp.float32)
    # deterministic parameter init (synthetic; not loaded from a checkpoint)
    wq = jax.random.normal(kq, (d_in, d_out), dtype=jnp.float32) * 0.05
    wk = jax.random.normal(kk, (d_in, d_out), dtype=jnp.float32) * 0.05
    wv = jax.random.normal(kv, (d_in, d_out), dtype=jnp.float32) * 0.05
    wo = jax.random.normal(ko, (d_out, d_out), dtype=jnp.float32) * 0.05
    bo = jax.random.normal(kb, (1, d_out), dtype=jnp.float32) * 0.05

    out, next_cache = multi_head_attention(x, wq, wk, wv, wo, bo, num_heads)
    out = jax.block_until_ready(out)

    ref = _reference(x, wq, wk, wv, wo, bo, num_heads)
    assert out.shape == (B, T, d_out)
    assert next_cache is None
    assert jnp.allclose(out, ref, atol=1e-4, rtol=1e-4), "mismatch vs reference"

    print("KERNEL_OK")
</pallas_src>

<mosaic_0001>
module attributes {stable_mosaic.version = 11 : i64} {
  func.func @_mha_kernel(%arg0: memref<16x32xf32, #tpu.memory_space<vmem>>, %arg1: memref<32x192xf32, #tpu.memory_space<vmem>>, %arg2: memref<64x64xf32, #tpu.memory_space<vmem>>, %arg3: memref<1x64xf32, #tpu.memory_space<vmem>>, %arg4: memref<16x64xf32, #tpu.memory_space<vmem>>) attributes {dimension_semantics = [], scalar_prefetch = 0 : i64, scratch_operands = 0 : i64, tpu.core_type = #tpu.core_type<tc>} {
    %c0 = arith.constant 0 : index
    %c0_0 = arith.constant 0 : index
    %0 = vector.load %arg0[%c0, %c0_0] : memref<16x32xf32, #tpu.memory_space<vmem>>, vector<16x32xf32>
    %c0_1 = arith.constant 0 : index
    %c0_2 = arith.constant 0 : index
    %1 = vector.load %arg1[%c0_1, %c0_2] : memref<32x192xf32, #tpu.memory_space<vmem>>, vector<32x192xf32>
    %cst = arith.constant dense<0.000000e+00> : vector<16x192xf32>
    %2 = tpu.matmul %0, %1, %cst {dimension_numbers = #tpu.dot_dimension_numbers<[1], [0], [0], [1], [0, 0, 1, 1], [], []>} : vector<16x32xf32>, vector<32x192xf32>, vector<16x192xf32> -> vector<16x192xf32>
    %3 = vector.extract_strided_slice %2 {offsets = [0, 0], sizes = [16, 64], strides = [1, 1]} : vector<16x192xf32> to vector<16x64xf32>
    %cst_3 = arith.constant 0.176776692 : f32
    %4 = vector.broadcast %cst_3 : f32 to vector<16x64xf32>
    %5 = arith.mulf %3, %4 : vector<16x64xf32>
    %6 = vector.extract_strided_slice %2 {offsets = [0, 64], sizes = [16, 64], strides = [1, 1]} : vector<16x192xf32> to vector<16x64xf32>
    %7 = vector.extract_strided_slice %2 {offsets = [0, 128], sizes = [16, 64], strides = [1, 1]} : vector<16x192xf32> to vector<16x64xf32>
    %8 = vector.extract_strided_slice %5 {offsets = [0, 0], sizes = [8, 32], strides = [1, 1]} : vector<16x64xf32> to vector<8x32xf32>
    %9 = vector.extract_strided_slice %5 {offsets = [0, 32], sizes = [8, 32], strides = [1, 1]} : vector<16x64xf32> to vector<8x32xf32>
    %10 = vector.extract_strided_slice %5 {offsets = [8, 0], sizes = [8, 32], strides = [1, 1]} : vector<16x64xf32> to vector<8x32xf32>
    %11 = vector.extract_strided_slice %5 {offsets = [8, 32], sizes = [8, 32], strides = [1, 1]} : vector<16x64xf32> to vector<8x32xf32>
    %12 = tpu.concatenate %8, %9, %10, %11 in 0 : vector<8x32xf32>, vector<8x32xf32>, vector<8x32xf32>, vector<8x32xf32> -> vector<32x32xf32>
    %13 = vector.shape_cast %12 : vector<32x32xf32> to vector<4x8x32xf32>
    %14 = vector.extract_strided_slice %6 {offsets = [0, 0], sizes = [8, 32], strides = [1, 1]} : vector<16x64xf32> to vector<8x32xf32>
    %15 = vector.extract_strided_slice %6 {offsets = [0, 32], sizes = [8, 32], strides = [1, 1]} : vector<16x64xf32> to vector<8x32xf32>
    %16 = vector.extract_strided_slice %6 {offsets = [8, 0], sizes = [8, 32], strides = [1, 1]} : vector<16x64xf32> to vector<8x32xf32>
    %17 = vector.extract_strided_slice %6 {offsets = [8, 32], sizes = [8, 32], strides = [1, 1]} : vector<16x64xf32> to vector<8x32xf32>
    %18 = tpu.concatenate %14, %15, %16, %17 in 0 : vector<8x32xf32>, vector<8x32xf32>, vector<8x32xf32>, vector<8x32xf32> -> vector<32x32xf32>
    %19 = vector.shape_cast %18 : vector<32x32xf32> to vector<4x8x32xf32>
    %20 = vector.extract_strided_slice %7 {offsets = [0, 0], sizes = [8, 32], strides = [1, 1]} : vector<16x64xf32> to vector<8x32xf32>
    %21 = vector.extract_strided_slice %7 {offsets = [0, 32], sizes = [8, 32], strides = [1, 1]} : vector<16x64xf32> to vector<8x32xf32>
    %22 = vector.extract_strided_slice %7 {offsets = [8, 0], sizes = [8, 32], strides = [1, 1]} : vector<16x64xf32> to vector<8x32xf32>
    %23 = vector.extract_strided_slice %7 {offsets = [8, 32], sizes = [8, 32], strides = [1, 1]} : vector<16x64xf32> to vector<8x32xf32>
    %24 = tpu.concatenate %20, %21, %22, %23 in 0 : vector<8x32xf32>, vector<8x32xf32>, vector<8x32xf32>, vector<8x32xf32> -> vector<32x32xf32>
    %25 = vector.shape_cast %24 : vector<32x32xf32> to vector<4x8x32xf32>
    "tpu.trace_start"() <{level = 10 : i32, message = "bqd,bkd->bqk"}> : () -> ()
    %cst_4 = arith.constant dense<0.000000e+00> : vector<4x8x8xf32>
    %26 = tpu.matmul %13, %19, %cst_4 {dimension_numbers = #tpu.dot_dimension_numbers<[2], [2], [1], [1], [0, 0, 0, 1, 1, 1], [0], [0]>} : vector<4x8x32xf32>, vector<4x8x32xf32>, vector<4x8x8xf32> -> vector<4x8x8xf32>
    "tpu.trace_stop"() : () -> ()
    %27 = tpu.iota {dimensions = array<i32: 0>} : vector<8x8xi32>
    %28 = tpu.iota {dimensions = array<i32: 1>} : vector<8x8xi32>
    %29 = arith.cmpi sgt, %28, %27 : vector<8x8xi32>
    %30 = vector.shape_cast %29 : vector<8x8xi1> to vector<1x8x8xi1>
    %cst_5 = arith.constant 0xFF800000 : f32
    %31 = vector.shape_cast %30 : vector<1x8x8xi1> to vector<1x8x8xi1>
    %32 = vector.broadcast %31 : vector<1x8x8xi1> to vector<4x8x8xi1>
    %33 = vector.broadcast %cst_5 : f32 to vector<4x8x8xf32>
    %34 = arith.select %32, %33, %26 : vector<4x8x8xi1>, vector<4x8x8xf32>
    %cst_6 = arith.constant dense<0xFF800000> : vector<4x8xf32>
    %35 = vector.multi_reduction <maximumf>, %34, %cst_6 [2] : vector<4x8x8xf32> to vector<4x8xf32>
    %36 = vector.shape_cast %35 : vector<4x8xf32> to vector<4x8x1xf32>
    %37 = vector.broadcast %36 : vector<4x8x1xf32> to vector<4x8x8xf32>
    %38 = arith.subf %34, %37 : vector<4x8x8xf32>
    %39 = math.exp %38 : vector<4x8x8xf32>
    %cst_7 = arith.constant dense<0.000000e+00> : vector<4x8xf32>
    %40 = vector.multi_reduction <add>, %39, %cst_7 [2] : vector<4x8x8xf32> to vector<4x8xf32>
    %41 = vector.shape_cast %40 : vector<4x8xf32> to vector<4x8x1xf32>
    %42 = vector.broadcast %41 : vector<4x8x1xf32> to vector<4x8x8xf32>
    %43 = arith.divf %39, %42 : vector<4x8x8xf32>
    "tpu.trace_start"() <{level = 10 : i32, message = "bqk,bkd->bqd"}> : () -> ()
    %cst_8 = arith.constant dense<0.000000e+00> : vector<4x8x32xf32>
    %44 = tpu.matmul %43, %25, %cst_8 {dimension_numbers = #tpu.dot_dimension_numbers<[2], [1], [1], [2], [0, 0, 0, 1, 1, 2], [0], [0]>} : vector<4x8x8xf32>, vector<4x8x32xf32>, vector<4x8x32xf32> -> vector<4x8x32xf32>
    "tpu.trace_stop"() : () -> ()
    %45 = vector.shape_cast %44 : vector<4x8x32xf32> to vector<32x32xf32>
    %46 = vector.extract_strided_slice %45 {offsets = [0, 0], sizes = [8, 32], strides = [1, 1]} : vector<32x32xf32> to vector<8x32xf32>
    %47 = vector.extract_strided_slice %45 {offsets = [8, 0], sizes = [8, 32], strides = [1, 1]} : vector<32x32xf32> to vector<8x32xf32>
    %48 = tpu.concatenate %46, %47 in 1 : vector<8x32xf32>, vector<8x32xf32> -> vector<8x64xf32>
    %49 = vector.extract_strided_slice %45 {offsets = [16, 0], sizes = [8, 32], strides = [1, 1]} : vector<32x32xf32> to vector<8x32xf32>
    %50 = vector.extract_strided_slice %45 {offsets = [24, 0], sizes = [8, 32], strides = [1, 1]} : vector<32x32xf32> to vector<8x32xf32>
    %51 = tpu.concatenate %49, %50 in 1 : vector<8x32xf32>, vector<8x32xf32> -> vector<8x64xf32>
    %52 = tpu.concatenate %48, %51 in 0 : vector<8x64xf32>, vector<8x64xf32> -> vector<16x64xf32>
    %c0_9 = arith.constant 0 : index
    %c0_10 = arith.constant 0 : index
    %53 = vector.load %arg2[%c0_9, %c0_10] : memref<64x64xf32, #tpu.memory_space<vmem>>, vector<64x64xf32>
    %cst_11 = arith.constant dense<0.000000e+00> : vector<16x64xf32>
    %54 = tpu.matmul %52, %53, %cst_11 {dimension_numbers = #tpu.dot_dimension_numbers<[1], [0], [0], [1], [0, 0, 1, 1], [], []>} : vector<16x64xf32>, vector<64x64xf32>, vector<16x64xf32> -> vector<16x64xf32>
    %c0_12 = arith.constant 0 : index
    %c0_13 = arith.constant 0 : index
    %55 = vector.load %arg3[%c0_12, %c0_13] : memref<1x64xf32, #tpu.memory_space<vmem>>, vector<1x64xf32>
    %56 = vector.broadcast %55 : vector<1x64xf32> to vector<16x64xf32>
    %57 = arith.addf %54, %56 : vector<16x64xf32>
    %c0_14 = arith.constant 0 : index
    %c0_15 = arith.constant 0 : index
    %58 = vector.load %arg4[%c0_14, %c0_15] : memref<16x64xf32, #tpu.memory_space<vmem>>, vector<16x64xf32>
    tpu.vector_store %arg4[%c0_14, %c0_15], %57 {strides = array<i32>} : memref<16x64xf32, #tpu.memory_space<vmem>>, vector<16x64xf32>,
    return
  }
}

</mosaic_0001>

<bundles_post_ra>
// kernel: tpu_custom_call.1
= control target key start
LH: loop header
LB: loop body
LE: loop exit
PB: predicated region body
PF: predicated region fallthrough
CT: control target
= control target key end

     0   :  { %9 = vsyncpa [#allocation3], 0  ;;  %s1373_s0 = inlined_call_operand.hbm [shape: f32[16,32], index: 0, kind: input, shape index: {}]   ;;  %s1374_s1 = inlined_call_operand.hbm [shape: f32[32,192], index: 1, kind: input, shape index: {}]   ;;  %s1375_s2 = inlined_call_operand.hbm [shape: f32[64,64], index: 2, kind: input, shape index: {}]   ;;  %s1376_s3 = inlined_call_operand.vmem [shape: f32[1,64], index: 3, kind: input, shape index: {}]   ;;  %s1377_s4 = inlined_call_operand.hbm [shape: f32[16,64], index: 4, kind: output, shape index: {}]  }
   0x1   :  { %10 = vsyncpa [#allocation6], 0 }
   0x2   :  { %11 = vsyncpa [#allocation4], 0  ;;  %s1203_s15 = smov [#allocation5]   ;;  %s1109_s19 = scalar_lea.hbm %s1374_s1, 1024 }
   0x3   :  { %s29_s16 = sshll.u32 %s1203_s15, 4  ;;  %p1110_p0 = scmp.ne.s32.totalorder %s1374_s1, %s1109_s19  ;;  %s30_s16 = int_to_ptr.vmem [resolvable:$true] %s29_s16 }
   0x4   :  { %p1113_p1 = scmp.lt.u32.totalorder %s1109_s19, %s1374_s1 }
   0x6   :  { %p1115_p2 = pnand %p1113_p1, %p1110_p0 }
   0x8   :  { %1118 = shalt.err (!%p1115_p2)
}
   0x9   :  { %s1119_s24 = scalar_lea.vmem %s30_s16, 1024  ;;  %p1124_p4 = scmp.lt.s32.totalorder %s30_s16, %s30_s16 }
   0xa   :  { %p1120_p3 = scmp.ne.s32.totalorder %s30_s16, %s1119_s24  ;;  %p1125_p5 = scmp.lt.s32.totalorder %s1119_s24, %s1119_s24 }
   0xc   :  { %p1126_p6 = por %p1125_p5, %p1124_p4 }
   0xe   :  { %p1127_p7 = pnand %p1126_p6, %p1120_p3 }
  0x10   :  { %1130 = shalt.err (!%p1127_p7)
}
  0x11   :  { %s1204_s25 = smov 256   ;;  %s1205_s26 = smov 16  }
  0x12   :  { %35 = dma.hbm_to_vmem [thread:$0]  %s1374_s1, 1024, %s30_s16, [#allocation6], %s1204_s25, %s1204_s25, %s1205_s26  }
  0x13   :  { %s1206_s29 = smov [#allocation2]   ;;  %s1131_s7 = scalar_lea.hbm %s1373_s0, 256 }
  0x14   :  { %s17_s30 = sshll.u32 %s1206_s29, 4  ;;  %p1132_p8 = scmp.ne.s32.totalorder %s1373_s0, %s1131_s7  ;;  %s18_s30 = int_to_ptr.vmem [resolvable:$true] %s17_s30 }
  0x15   :  { %p1135_p9 = scmp.lt.u32.totalorder %s1131_s7, %s1373_s0 }
  0x17   :  { %p1137_p10 = pnand %p1135_p9, %p1132_p8 }
  0x19   :  { %1140 = shalt.err (!%p1137_p10)
}
  0x1a   :  { %s1141_s12 = scalar_lea.vmem %s18_s30, 256  ;;  %p1146_p12 = scmp.lt.s32.totalorder %s18_s30, %s18_s30 }
  0x1b   :  { %p1142_p11 = scmp.ne.s32.totalorder %s18_s30, %s1141_s12  ;;  %p1147_p13 = scmp.lt.s32.totalorder %s1141_s12, %s1141_s12 }
  0x1d   :  { %p1148_p0 = por %p1147_p13, %p1146_p12 }
  0x1f   :  { %p1149_p1 = pnand %p1148_p0, %p1142_p11 }
  0x21   :  { %1152 = shalt.err (!%p1149_p1)
}
  0x22   :  { %s1207_s1 = smov 128   ;;  %s1208_s13 = smov 8  }
  0x23   :  { %23 = dma.hbm_to_vmem [thread:$0]  %s1373_s0, 256, %s18_s30, [#allocation3], %s1207_s1, %s1207_s1, %s1208_s13  }
  0x24   :  { %s1209_s16 = smov [#allocation7]   ;;  %s1153_s20 = scalar_lea.hbm %s1375_s2, 1024 }
  0x25   :  { %s41_s17 = sshll.u32 %s1209_s16, 4  ;;  %p1154_p2 = scmp.ne.s32.totalorder %s1375_s2, %s1153_s20  ;;  %s42_s17 = int_to_ptr.vmem [resolvable:$true] %s41_s17 }
  0x26   :  { %p1157_p3 = scmp.lt.u32.totalorder %s1153_s20, %s1375_s2 }
  0x28   :  { %p1159_p4 = pnand %p1157_p3, %p1154_p2 }
  0x2a   :  { %1162 = shalt.err (!%p1159_p4)
}
  0x2b   :  { %s1163_s25 = scalar_lea.vmem %s42_s17, 1024  ;;  %p1168_p6 = scmp.lt.s32.totalorder %s42_s17, %s42_s17 }
  0x2c   :  { %p1164_p5 = scmp.ne.s32.totalorder %s42_s17, %s1163_s25  ;;  %p1169_p7 = scmp.lt.s32.totalorder %s1163_s25, %s1163_s25 }
  0x2e   :  { %p1170_p8 = por %p1169_p7, %p1168_p6 }
  0x30   :  { %p1171_p9 = pnand %p1170_p8, %p1164_p5 }
  0x32   :  { %1174 = shalt.err (!%p1171_p9)
}
  0x33   :  { %47 = dma.hbm_to_vmem [thread:$0]  %s1375_s2, 1024, %s42_s17, [#allocation6], %s1207_s1, %s1207_s1, %s1208_s13  }
  0x34   :  { %1197 = dma.done.wait [#allocation3], 256  }
  0x35   :  { %1198 = vsyncadd [#allocation3], 4294967040 }
  0x36   :  { %1199 = dma.done.wait [#allocation6], 2048  }
  0x37   :  { %1200 = vsyncadd [#allocation6], 4294965248  ;;  %v1210_v0 = vmov 0.0   ;;  %v62_v1 = vld [vmem:[#allocation5 + $0x8] sm:$0xff]  ;;  %v64_v2 = vld [vmem:[#allocation5 + $0x18] sm:$0xff]  ;;  %vm69_vm0 = vcmask 261120   ;;  %v479_v31 = vlaneseq }
  0x38   :  { %140 = vmatprep.mubr.f32.mxu0 %v1210_v0  ;;  %1002 = vmatprep.subr.mxu1 %v1210_v0  ;;  %v61_v3 = vld [vmem:[#allocation5] sm:$0xff]  ;;  %v1056_v4 = vpack.c.bf16 %v64_v2, %v62_v1  ;;  %v63_v5 = vld [vmem:[#allocation5 + $0x10] sm:$0xff]  ;;  %v66_v6 = vld [vmem:[#allocation5 + $0x28] sm:$0xff]  ;;  %vm1211_vm1 = vmmov 0   ;;  %s1212_s2 = smov 64   ;;  %s1213_s27 = smov 96  }
  0x39   :  { %v68_v7 = vld [vmem:[#allocation5 + $0x38] sm:$0xff]  ;;  %v1058_v8 = vpack.c.bf16 %v63_v5, %v61_v3  ;;  %v65_v10 = vld [vmem:[#allocation5 + $0x20] sm:$0xff]  ;;  %v67_v11 = vld [vmem:[#allocation5 + $0x30] sm:$0xff]  ;;  %1004 = vmatprep.mubr.msk.f32.mxu1 %vm1211_vm1, %v1210_v0  ;;  %v480_v32 = vshrl.u32 %v479_v31, 7  ;;  %v482_v33 = vand.u32 127, %v479_v31  ;;  %vm490_vm3 = vcmask 64512  }
  0x3a   :  { %v1060_v9 = vpack.c.bf16 %v68_v7, %v66_v6  ;;  %1057 = vmatprep.subr.bf16.mxu0 %v1056_v4  ;;  %v1062_v12 = vpack.c.bf16 %v67_v11, %v65_v10  ;;  %v59_v13 = vld [vmem:[#allocation2] sm:$0xff]  ;;  %v60_v14 = vld [vmem:[#allocation2 + $0x8] sm:$0xff]  ;;  %s1214_s28 = smov 32   ;;  %vm852_vm4 = vcmask 523264   ;;  %s1215_s5 = smov [#allocation8]  }
  0x3b   :  { %1059 = vmatpush1.bf16.msra.mxu0 %v1058_v8  ;;  %vm483_vm2 = vcmp.gt.s32.totalorder %v482_v33, %v480_v32  ;;  %s941_s6 = sshll.u32 %s1215_s5, 4  ;;  %s942_s6 = int_to_ptr.vmem [resolvable:$true] %s941_s6 }
  0x3c   :  { %1061 = vmatprep.subr.bf16.mxu0 %v1060_v9  ;;  %s1175_s7 = scalar_lea.vmem %s942_s6, 256  ;;  %p1180_p11 = scmp.lt.s32.totalorder %s942_s6, %s942_s6 }
  0x3d   :  { %p1176_p10 = scmp.ne.s32.totalorder %s942_s6, %s1175_s7  ;;  %p1181_p12 = scmp.lt.s32.totalorder %s1175_s7, %s1175_s7 }
  0x3f   :  { %1063 = vmatpush1.bf16.msra.mxu0 %v1062_v12  ;;  %p1182_p13 = por %p1181_p12, %p1180_p11 }
  0x40   :  { %997 = vmatprep.subr.mxu0 %v1210_v0 }
  0x41   :  { %p1183_p0 = pnand %p1182_p13, %p1176_p10 }
  0x42   :  { %954 = vmatmul.mubr.msk.f32.vlgmr.msra.gmra.mrb[0].mxu0 %vm69_vm0, %v59_v13 }
  0x43   :  { %146 = vmatprep.mubr.f32.mxu0 %v1210_v0 }
  0x46   :  { %955 = vmatmul.mubr.msk.f32.gmra.mrb[2].mxu0 %vm69_vm0, %v60_v14 }
  0x47   :  { %999 = vmatprep.mubr.msk.f32.mxu0 %vm1211_vm1, %v1210_v0 }
 0x115   :  { %v142_v15 = vpop.f32.mrb[0].mxu0 }
 0x116   :  { %175 = vrot.lane.b32.xlu1 %v142_v15, %s1212_s2  ;;  %162 = vrot.lane.b32.xlu0 %v142_v15, %s1213_s27  ;;  %v1294_v16 = vpop.f32.mrb[1].mxu0  ;;  %v153_v19 = vmul.f32 0.17677669, %v142_v15 }
 0x119   :  { %v148_v17 = vpop.f32.mrb[2].mxu0 }
 0x11a   :  { %165 = vrot.lane.b32.xlu0 %v148_v17, %s1213_s27  ;;  %v1297_v18 = vpop.f32.mrb[3].mxu0  ;;  %v154_v20 = vmul.f32 0.17677669, %v148_v17 }
 0x11e   :  { %156 = vrot.lane.b32.xlu0 %v153_v19, %s1213_s27 }
 0x122   :  { %159 = vrot.lane.b32.xlu0 %v154_v20, %s1213_s27 }
 0x188   :  { %v176_v21 = vpop.permute.xlu1 %175  ;;  %v163_v22 = vpop.permute.xlu0 %162 }
 0x189   :  { %998 = vmatpush3.xpose.msk.msra.mxu0 %vm69_vm0, %v176_v21  ;;  %251 = vrot.lane.b32.xlu1 %v163_v22, %s1212_s2  ;;  %v838_v21 = vld [vmem:[#allocation7 + $0x8] sm:$0xff]  ;;  %v839_v22 = vld [vmem:[#allocation7 + $0x10] sm:$0xff] }
 0x18a   :  { %1012 = vmatprep.subr.mxu0 %v1210_v0 }
 0x18c   :  { %1000 = vmatmul.mubr.msk.f32.vlgmr.msra.gmra.mrb[4].mxu0 %vm69_vm0, %v153_v19  ;;  %v166_v23 = vpop.permute.xlu0 %165 }
 0x18d   :  { %403 = vrot.lane.b32.xlu1 %v166_v23, %s1212_s2  ;;  %1014 = vmatprep.mubr.msk.f32.mxu0 %vm1211_vm1, %v1210_v0 }
 0x190   :  { %v157_v25 = vpop.permute.xlu0 %156 }
 0x191   :  { %327 = vrot.lane.b32.xlu1 %v148_v17, %s1212_s2 }
 0x194   :  { %v160_v27 = vpop.permute.xlu0 %159 }
 0x1fb   :  { %v252_v24 = vpop.permute.xlu1 %251 }
 0x1fc   :  { %1003 = vmatpush3.xpose.msk.msra.mxu1 %vm69_vm0, %v252_v24  ;;  %v840_v24 = vld [vmem:[#allocation7 + $0x18] sm:$0xff] }
 0x1fd   :  { %1007 = vmatprep.subr.mxu1 %v1210_v0 }
 0x1ff   :  { %v404_v26 = vpop.permute.xlu1 %403  ;;  %1005 = vmatmul.mubr.msk.f32.vlgmr.msra.gmra.mrb[0].mxu1 %vm69_vm0, %v157_v25  ;;  %v1068_v25 = vpack.c.bf16 %v840_v24, %v839_v22 }
 0x200   :  { %1013 = vmatpush3.xpose.msk.msra.mxu0 %vm69_vm0, %v404_v26  ;;  %1009 = vmatprep.mubr.msk.f32.mxu1 %vm1211_vm1, %v1210_v0  ;;  %v841_v26 = vld [vmem:[#allocation7 + $0x20] sm:$0xff] }
 0x201   :  { %1022 = vmatprep.subr.mxu0 %v1210_v0 }
 0x203   :  { %v328_v28 = vpop.permute.xlu1 %327  ;;  %1015 = vmatmul.mubr.msk.f32.vlgmr.msra.gmra.mrb[6].mxu0 %vm69_vm0, %v160_v27  ;;  %v842_v27 = vld [vmem:[#allocation7 + $0x28] sm:$0xff] }
 0x204   :  { %1008 = vmatpush3.xpose.msk.msra.mxu1 %vm69_vm0, %v328_v28  ;;  %1024 = vmatprep.mubr.msk.f32.mxu0 %vm1211_vm1, %v1210_v0  ;;  %v1072_v28 = vpack.c.bf16 %v842_v27, %v841_v26 }
 0x205   :  { %1017 = vmatprep.subr.mxu1 %v1210_v0 }
 0x207   :  { %1010 = vmatmul.mubr.msk.f32.vlgmr.msra.gmra.mrb[2].mxu1 %vm69_vm0, %v154_v20  ;;  %v837_v20 = vld [vmem:[#allocation7] sm:$0xff] }
 0x208   :  { %1018 = vmatpush3.msra.mxu1 %v1294_v16  ;;  %1019 = vmatprep.mubr.msk.f32.mxu1 %vm1211_vm1, %v1210_v0  ;;  %v1064_v23 = vpack.c.bf16 %v838_v21, %v837_v20 }
 0x209   :  { %1027 = vmatprep.subr.mxu1 %v1210_v0 }
 0x25f   :  { %v247_v29 = vpop.f32.mrb[4].mxu0 }
 0x260   :  { %v1001_v30 = vpop.f32.mrb[5].mxu0  ;;  %v486_v38 = vsel %vm483_vm2, -inf, %v247_v29 }
 0x261   :  { %v491_v42 = vsel %vm490_vm3, %v486_v38, -inf }
 0x2d2   :  { %v323_v34 = vpop.f32.mrb[0].mxu1 }
 0x2d3   :  { %v487_v35 = vsel %vm483_vm2, -inf, %v323_v34  ;;  %v1006_v36 = vpop.f32.mrb[1].mxu1 }
 0x2d4   :  { %v494_v37 = vsel %vm490_vm3, %v487_v35, -inf }
 0x2d5   :  { %495 = vmax.xlane.f32.xlu0 %v494_v37 }
 0x2d6   :  { %v475_v39 = vpop.f32.mrb[6].mxu0 }
 0x2d7   :  { %v489_v40 = vsel %vm483_vm2, -inf, %v475_v39  ;;  %v1016_v41 = vpop.f32.mrb[7].mxu0 }
 0x2d8   :  { %v500_v43 = vsel %vm490_vm3, %v489_v40, -inf }
 0x2d9   :  { %492 = vmax.xlane.f32.xlu0 %v491_v42  ;;  %501 = vmax.xlane.f32.xlu1 %v500_v43  ;;  %v968_v42 = vld [vmem:[%s1376_s3] ss:$0 sm:$0xff] }
 0x2da   :  { %v399_v44 = vpop.f32.mrb[2].mxu1 }
 0x2db   :  { %v488_v45 = vsel %vm483_vm2, -inf, %v399_v44  ;;  %v1011_v46 = vpop.f32.mrb[3].mxu1 }
 0x2dc   :  { %v497_v47 = vsel %vm490_vm3, %v488_v45, -inf }
 0x2dd   :  { %498 = vmax.xlane.f32.xlu0 %v497_v47 }
 0x362   :  { %v496_v48 = vpop.xlane.xlu0 %495 }
 0x363   :  { %v504_v49 = vsub.f32 %v487_v35, %v496_v48 }
 0x365   :  { %v509_v50 = vmul.f32 1.442695, %v504_v49 }
 0x366   :  { %v502_v51 = vpop.xlane.xlu1 %501  ;;  %v493_v58 = vpop.xlane.xlu0 %492 }
 0x367   :  { %1093 = vpow2.f32 %v509_v50  ;;  %v506_v52 = vsub.f32 %v489_v40, %v502_v51  ;;  %v503_v59 = vsub.f32 %v486_v38, %v493_v58 }
 0x369   :  { %v513_v53 = vmul.f32 1.442695, %v506_v52  ;;  %v507_v61 = vmul.f32 1.442695, %v503_v59 }
 0x36a   :  { %v499_v60 = vpop.xlane.xlu0 %498 }
 0x36b   :  { %1095 = vpow2.f32 %v513_v53  ;;  %v505_v62 = vsub.f32 %v488_v45, %v499_v60 }
 0x36c   :  { %1097 = vpow2.f32 %v507_v61 }
 0x36d   :  { %v511_v63 = vmul.f32 1.442695, %v505_v62 }
 0x36f   :  { %1099 = vpow2.f32 %v511_v63 }
 0x371   :  { %v1094_v54 = vpop.eup %1093 }
 0x372   :  { %v518_v55 = vsel %vm490_vm3, %v1094_v54, 0.0 }
 0x373   :  { %519 = vadd.xlane.f32.xlu1 %v518_v55 }
 0x375   :  { %v1096_v56 = vpop.eup %1095 }
 0x376   :  { %v524_v57 = vsel %vm490_vm3, %v1096_v56, 0.0  ;;  %v1098_v1 = vpop.eup %1097 }
 0x377   :  { %525 = vadd.xlane.f32.xlu0 %v524_v57  ;;  %v515_v2 = vsel %vm490_vm3, %v1098_v1, 0.0 }
 0x379   :  { %v1100_v3 = vpop.eup %1099 }
 0x37a   :  { %v521_v4 = vsel %vm490_vm3, %v1100_v3, 0.0 }
 0x384   :  { %168 = vrot.lane.b32.xlu1 %v1294_v16, %s1213_s27 }
 0x38d   :  { %172 = vrot.lane.b32.xlu0 %v1297_v18, %s1213_s27 }
 0x3a8   :  { %516 = vadd.xlane.f32.xlu1 %v515_v2 }
 0x3ac   :  { %522 = vadd.xlane.f32.xlu0 %v521_v4 }
 0x400   :  { %v520_v5 = vpop.xlane.xlu1 %519 }
 0x401   :  { %1101 = vrcp.f32 %v520_v5 }
 0x404   :  { %v169_v6 = vpop.permute.xlu1 %168  ;;  %v526_v7 = vpop.xlane.xlu0 %525 }
 0x405   :  { %1023 = vmatpush3.msra.mxu0 %v169_v6  ;;  %1103 = vrcp.f32 %v526_v7 }
 0x406   :  { %1032 = vmatprep.subr.mxu0 %v1210_v0 }
 0x408   :  { %v173_v10 = vpop.permute.xlu0 %172 }
 0x40b   :  { %v1102_v8 = vpop.eup %1101 }
 0x40c   :  { %v530_v9 = vmul.f32 %v1102_v8, %v1094_v54 }
 0x40e   :  { %1025 = vmatmul.mubr.msk.f32.vlgmr.msra.gmra.mrb[8].mxu0 %vm490_vm3, %v530_v9 }
 0x40f   :  { %1033 = vmatpush3.msra.mxu0 %v173_v10  ;;  %1034 = vmatprep.mubr.msk.f32.mxu0 %vm1211_vm1, %v1210_v0  ;;  %v1104_v11 = vpop.eup %1103 }
 0x410   :  { %v534_v12 = vmul.f32 %v1104_v11, %v1096_v56 }
 0x412   :  { %1035 = vmatmul.mubr.msk.f32.vlgmr.msra.gmra.mrb[10].mxu0 %vm490_vm3, %v534_v12 }
 0x435   :  { %v517_v13 = vpop.xlane.xlu1 %516 }
 0x436   :  { %1105 = vrcp.f32 %v517_v13 }
 0x439   :  { %v523_v14 = vpop.xlane.xlu0 %522 }
 0x43a   :  { %1107 = vrcp.f32 %v523_v14 }
 0x440   :  { %v1106_v15 = vpop.eup %1105 }
 0x441   :  { %v528_v16 = vmul.f32 %v1106_v15, %v1098_v1 }
 0x443   :  { %1020 = vmatmul.mubr.msk.f32.vlgmr.msra.gmra.mrb[4].mxu1 %vm490_vm3, %v528_v16 }
 0x444   :  { %1028 = vmatpush3.msra.mxu1 %v1297_v18  ;;  %1029 = vmatprep.mubr.msk.f32.mxu1 %vm1211_vm1, %v1210_v0  ;;  %v1108_v17 = vpop.eup %1107  ;;  %v843_v0 = vld [vmem:[#allocation7 + $0x30] sm:$0xff]  ;;  %v844_v18 = vld [vmem:[#allocation7 + $0x38] sm:$0xff] }
 0x445   :  { %v532_v19 = vmul.f32 %v1108_v17, %v1100_v3  ;;  %1065 = vmatprep.subr.bf16.mxu1 %v1064_v23  ;;  %v1076_v29 = vpack.c.bf16 %v844_v18, %v843_v0 }
 0x447   :  { %1030 = vmatmul.mubr.msk.f32.vlgmr.msra.gmra.mrb[6].mxu1 %vm490_vm3, %v532_v19 }
 0x448   :  { %1067 = vmatpush3.bf16.msra.mxu1 %v1064_v23 }
 0x449   :  { %1069 = vmatprep.subr.bf16.mxu1 %v1068_v25 }
 0x44c   :  { %1071 = vmatpush3.bf16.msra.mxu1 %v1068_v25 }
 0x44d   :  { %1073 = vmatprep.subr.bf16.mxu1 %v1072_v28 }
 0x450   :  { %1075 = vmatpush3.bf16.msra.mxu1 %v1072_v28 }
 0x451   :  { %1077 = vmatprep.subr.bf16.mxu1 %v1076_v29 }
 0x454   :  { %1079 = vmatpush3.bf16.msra.mxu1 %v1076_v29 }
 0x4e1   :  { %v677_v30 = vpop.f32.mrb[8].mxu0 }
 0x4e2   :  { %828 = vrot.lane.b32.xlu1 %v677_v30, %s1214_s28  ;;  %v1026_v31 = vpop.f32.mrb[9].mxu0 }
 0x4e5   :  { %v823_v32 = vpop.f32.mrb[10].mxu0 }
 0x4e6   :  { %833 = vrot.lane.b32.xlu0 %v823_v32, %s1214_s28  ;;  %v1036_v33 = vpop.f32.mrb[11].mxu0 }
 0x516   :  { %v604_v34 = vpop.f32.mrb[4].mxu1 }
 0x517   :  { %v1021_v35 = vpop.f32.mrb[5].mxu1 }
 0x51a   :  { %v750_v36 = vpop.f32.mrb[6].mxu1 }
 0x51b   :  { %v1031_v37 = vpop.f32.mrb[7].mxu1 }
 0x554   :  { %v829_v38 = vpop.permute.xlu1 %828 }
 0x555   :  { %v831_v39 = vsel %vm69_vm0, %v604_v34, %v829_v38 }
 0x556   :  { %1053 = vmatprep.mubr.msk.f32.mxu1 %vm852_vm4, %v831_v39 }
 0x558   :  { %v834_v40 = vpop.permute.xlu0 %833 }
 0x559   :  { %v836_v41 = vsel %vm69_vm0, %v750_v36, %v834_v40 }
 0x55a   :  { %1054 = vmatmul.mubr.msk.f32.vlgmr.msra.gmra.mrb[8].mxu1 %vm852_vm4, %v836_v41 }
 0x62d   :  { %v1055_v43 = vpop.f32.mrb[8].mxu1 }
 0x62e   :  { %v931_v44 = vadd.f32 %v1055_v43, %v968_v42  ;;  %v925_v45 = vpop.f32.mrb[9].mxu1 }
 0x62f   :  { %v926_v46 = vadd.f32 %v968_v42, %v925_v45 }
 0x630   :  { %935 = vst.msk [vmem:[#allocation8 + $0x8] sm:$0xff] %vm852_vm4, %v931_v44 }
 0x631   :  { %934 = vst.msk [vmem:[#allocation8] sm:$0xff] %vm852_vm4, %v926_v46 }
 0x632   :  { %1186 = shalt.err (!%p1183_p0)
}
 0x633   :  { %s1187_s9 = scalar_lea.hbm %s1377_s4, 256 }
 0x634   :  { %p1188_p1 = scmp.ne.s32.totalorder %s1377_s4, %s1187_s9  ;;  %p1191_p2 = scmp.lt.u32.totalorder %s1187_s9, %s1377_s4 }
 0x636   :  { %p1193_p3 = pnand %p1191_p2, %p1188_p1 }
 0x638   :  { %1196 = shalt.err (!%p1193_p3)
}
 0x639   :  { %947 = dma.vmem_to_hbm [thread:$0]  %s942_s6, 256, %s1377_s4, [#allocation4], %s1207_s1, %s1207_s1, %s1208_s13  }
 0x63a   :  { %1201 = dma.done.wait [#allocation4], 256  }
 0x63b   :  { %1202 = vsyncadd [#allocation4], 4294967040 }
 0x63c   :  { %951 = vsyncpa [#allocation3], 1 }
 0x63d   :  { %952 = vsyncpa [#allocation6], 1 }
 0x63e   :  { %953 = vsyncpa [#allocation4], 1 }

</bundles_post_ra>
